<compile_context>
chip_gen: v7x
topology: tpu7x:2x2x1
jax: 0.10.0
libtpu: 0.0.40
codegen_flags: <defaults>
</compile_context>

<pallas_src>
import functools

import jax
import jax.numpy as jnp
import numpy as np
from jax.experimental import pallas as pl
from jax.experimental.pallas import tpu as pltpu


def _lstm_kernel(x_ref, wih_ref, whh_ref, b_ref, h_ref, c_ref, *, hidden):
    t = pl.program_id(0)

    # h / c are grid-carried accumulators (same output block for every t):
    # initialize them once, on the first time step.
    @pl.when(t == 0)
    def _():
        h_ref[...] = jnp.zeros_like(h_ref)
        c_ref[...] = jnp.zeros_like(c_ref)

    x_t = x_ref[0]          # (B, D)  current time step (block (1, B, D))
    h_prev = h_ref[...]     # (B, H)
    c_prev = c_ref[...]     # (B, H)

    # All four gates in one fused (B, 4H) slab: [i | f | g | o] (PyTorch order).
    gates = (jnp.dot(x_t, wih_ref[...], preferred_element_type=jnp.float32)
             + jnp.dot(h_prev, whh_ref[...], preferred_element_type=jnp.float32)
             + b_ref[...])                                    # (B, 4H)

    i = jax.nn.sigmoid(gates[:, 0 * hidden:1 * hidden])
    f = jax.nn.sigmoid(gates[:, 1 * hidden:2 * hidden])
    g = jnp.tanh(gates[:, 2 * hidden:3 * hidden])
    o = jax.nn.sigmoid(gates[:, 3 * hidden:4 * hidden])

    c_new = f * c_prev + i * g
    h_ref[...] = o * jnp.tanh(c_new)
    c_ref[...] = c_new


def rnn_encoder_forward(x, params):
    """x: (B, T, D) float32, batch_first. Returns (h, c), each (1, B, H) —
    same as `_, (h, c) = nn.LSTM(D, H, num_layers=1, batch_first=True)(x)`."""
    W_ih, W_hh = params["W_ih"], params["W_hh"]          # (4H, D), (4H, H)
    b_ih, b_hh = params["b_ih"], params["b_hh"]          # (4H,),  (4H,)
    B, T, D = x.shape
    H = W_ih.shape[0] // 4

    # ---- glue (tiny, one-time): time-major input + pre-transposed weights ----
    x_tm = jnp.transpose(x, (1, 0, 2)).astype(jnp.float32)       # (T, B, D)
    wih = jnp.transpose(W_ih).astype(jnp.float32)                # (D, 4H)
    whh = jnp.transpose(W_hh).astype(jnp.float32)                # (H, 4H)
    b = (b_ih + b_hh).reshape(1, 4 * H).astype(jnp.float32)      # fused bias

    grid_spec = pltpu.PrefetchScalarGridSpec(
        num_scalar_prefetch=0,
        grid=(T,),
        in_specs=[
            # one time step per grid iteration, pipelined/double-buffered
            pl.BlockSpec((1, B, D), lambda t: (t, 0, 0)),
            # weights / bias: VMEM-resident for the whole grid
            pl.BlockSpec((D, 4 * H), lambda t: (0, 0)),
            pl.BlockSpec((H, 4 * H), lambda t: (0, 0)),
            pl.BlockSpec((1, 4 * H), lambda t: (0, 0)),
        ],
        out_specs=(
            # constant block index across t -> h/c carried in VMEM, 1 HBM write
            pl.BlockSpec((B, H), lambda t: (0, 0)),
            pl.BlockSpec((B, H), lambda t: (0, 0)),
        ),
    )

    flops = int(T * (2 * B * D * 4 * H + 2 * B * H * 4 * H + 10 * B * H))
    transcendentals = int(T * B * 4 * H)
    bytes_accessed = int(4 * (x_tm.size + wih.size + whh.size + b.size + 2 * B * H))

    h, c = pl.pallas_call(
        functools.partial(_lstm_kernel, hidden=H),
        out_shape=(jax.ShapeDtypeStruct((B, H), jnp.float32),
                   jax.ShapeDtypeStruct((B, H), jnp.float32)),
        grid_spec=grid_spec,
        compiler_params=pltpu.CompilerParams(
            dimension_semantics=("arbitrary",)),     # sequential recurrence
        cost_estimate=pl.CostEstimate(
            flops=flops, transcendentals=transcendentals,
            bytes_accessed=bytes_accessed),
    )(x_tm, wih, whh, b)

    return h[None], c[None]                          # (1, B, H) each, like torch


def _numpy_ref(x, W_ih, W_hh, b_ih, b_hh):
    """Direct loop implementation of torch nn.LSTM (num_layers=1, zero init)."""
    x = np.asarray(x, np.float32)
    W_ih = np.asarray(W_ih, np.float32); W_hh = np.asarray(W_hh, np.float32)
    b_ih = np.asarray(b_ih, np.float32); b_hh = np.asarray(b_hh, np.float32)
    B, T, D = x.shape
    H = W_ih.shape[0] // 4
    h = np.zeros((B, H), np.float32)
    c = np.zeros((B, H), np.float32)

    def sigm(z):
        return 1.0 / (1.0 + np.exp(-z))

    for t in range(T):
        gates = x[:, t] @ W_ih.T + h @ W_hh.T + b_ih + b_hh
        i = sigm(gates[:, 0 * H:1 * H])
        f = sigm(gates[:, 1 * H:2 * H])
        g = np.tanh(gates[:, 2 * H:3 * H])
        o = sigm(gates[:, 3 * H:4 * H])
        c = f * c + i * g
        h = o * np.tanh(c)
    return h[None], c[None]


if __name__ == "__main__":
    B, T, D, H = 2, 16, 4, 32      # batch=2, seq=16, input_dim=4, hidden=32

    key = jax.random.PRNGKey(0)
    kx, k1, k2, k3, k4 = jax.random.split(key, 5)
    x = jax.random.normal(kx, (B, T, D), dtype=jnp.float32)
    params = {
        "W_ih": 0.1 * jax.random.normal(k1, (4 * H, D), dtype=jnp.float32),   # weight_ih_l0
        "W_hh": 0.1 * jax.random.normal(k2, (4 * H, H), dtype=jnp.float32),   # weight_hh_l0
        "b_ih": 0.1 * jax.random.normal(k3, (4 * H,), dtype=jnp.float32),     # bias_ih_l0
        "b_hh": 0.1 * jax.random.normal(k4, (4 * H,), dtype=jnp.float32),     # bias_hh_l0
    }

    h, c = jax.block_until_ready(rnn_encoder_forward(x, params))
    assert h.shape == (1, B, H), h.shape
    assert c.shape == (1, B, H), c.shape

    h_ref, c_ref = _numpy_ref(x, params["W_ih"], params["W_hh"],
                              params["b_ih"], params["b_hh"])
    np.testing.assert_allclose(np.asarray(h), h_ref, rtol=1e-3, atol=1e-3)
    np.testing.assert_allclose(np.asarray(c), c_ref, rtol=1e-3, atol=1e-3)

    print("KERNEL_OK")
</pallas_src>

<mosaic_0001>
module attributes {stable_mosaic.version = 11 : i64} {
  func.func @_lstm_kernel(%arg0: i32, %arg1: memref<1x2x4xf32, #tpu.memory_space<vmem>>, %arg2: memref<4x128xf32, #tpu.memory_space<vmem>>, %arg3: memref<32x128xf32, #tpu.memory_space<vmem>>, %arg4: memref<1x128xf32, #tpu.memory_space<vmem>>, %arg5: memref<2x32xf32, #tpu.memory_space<vmem>>, %arg6: memref<2x32xf32, #tpu.memory_space<vmem>>) attributes {dimension_semantics = [#tpu.dimension_semantics<arbitrary>], iteration_bounds = array<i64: 16>, scalar_prefetch = 0 : i64, scratch_operands = 0 : i64, tpu.core_type = #tpu.core_type<tc>, window_params = [{transform_indices = @transform_0, window_bounds = array<i64: 1, 2, 4>}, {pipeline_mode = #tpu.pipeline_mode<synchronous>, transform_indices = @transform_1, window_bounds = array<i64: 4, 128>}, {pipeline_mode = #tpu.pipeline_mode<synchronous>, transform_indices = @transform_2, window_bounds = array<i64: 32, 128>}, {pipeline_mode = #tpu.pipeline_mode<synchronous>, transform_indices = @transform_3, window_bounds = array<i64: 1, 128>}, {pipeline_mode = #tpu.pipeline_mode<synchronous>, transform_indices = @transform_4, window_bounds = array<i64: 2, 32>}, {pipeline_mode = #tpu.pipeline_mode<synchronous>, transform_indices = @transform_5, window_bounds = array<i64: 2, 32>}]} {
    %c0_i32 = arith.constant 0 : i32
    %0 = arith.cmpi eq, %arg0, %c0_i32 : i32
    %1 = arith.extui %0 : i1 to i32
    %c0_i32_0 = arith.constant 0 : i32
    %2 = arith.cmpi ne, %1, %c0_i32_0 : i32
    scf.if %2 {
      %cst_21 = arith.constant 0.000000e+00 : f32
      %42 = vector.broadcast %cst_21 : f32 to vector<2x32xf32>
      %c0_22 = arith.constant 0 : index
      %c0_23 = arith.constant 0 : index
      %43 = vector.load %arg5[%c0_22, %c0_23] : memref<2x32xf32, #tpu.memory_space<vmem>>, vector<2x32xf32>
      tpu.vector_store %arg5[%c0_22, %c0_23], %42 {strides = array<i32>} : memref<2x32xf32, #tpu.memory_space<vmem>>, vector<2x32xf32>,
      %cst_24 = arith.constant 0.000000e+00 : f32
      %44 = vector.broadcast %cst_24 : f32 to vector<2x32xf32>
      %c0_25 = arith.constant 0 : index
      %c0_26 = arith.constant 0 : index
      %45 = vector.load %arg6[%c0_25, %c0_26] : memref<2x32xf32, #tpu.memory_space<vmem>>, vector<2x32xf32>
      tpu.vector_store %arg6[%c0_25, %c0_26], %44 {strides = array<i32>} : memref<2x32xf32, #tpu.memory_space<vmem>>, vector<2x32xf32>,
    } else {
    }
    %c0 = arith.constant 0 : index
    %c0_1 = arith.constant 0 : index
    %c0_2 = arith.constant 0 : index
    %3 = vector.load %arg1[%c0, %c0_1, %c0_2] : memref<1x2x4xf32, #tpu.memory_space<vmem>>, vector<1x2x4xf32>
    %4 = vector.shape_cast %3 : vector<1x2x4xf32> to vector<2x4xf32>
    %c0_3 = arith.constant 0 : index
    %c0_4 = arith.constant 0 : index
    %5 = vector.load %arg5[%c0_3, %c0_4] : memref<2x32xf32, #tpu.memory_space<vmem>>, vector<2x32xf32>
    %c0_5 = arith.constant 0 : index
    %c0_6 = arith.constant 0 : index
    %6 = vector.load %arg6[%c0_5, %c0_6] : memref<2x32xf32, #tpu.memory_space<vmem>>, vector<2x32xf32>
    %c0_7 = arith.constant 0 : index
    %c0_8 = arith.constant 0 : index
    %7 = vector.load %arg2[%c0_7, %c0_8] : memref<4x128xf32, #tpu.memory_space<vmem>>, vector<4x128xf32>
    %cst = arith.constant dense<0.000000e+00> : vector<2x128xf32>
    %8 = tpu.matmul %4, %7, %cst {dimension_numbers = #tpu.dot_dimension_numbers<[1], [0], [0], [1], [0, 0, 1, 1], [], []>} : vector<2x4xf32>, vector<4x128xf32>, vector<2x128xf32> -> vector<2x128xf32>
    %c0_9 = arith.constant 0 : index
    %c0_10 = arith.constant 0 : index
    %9 = vector.load %arg3[%c0_9, %c0_10] : memref<32x128xf32, #tpu.memory_space<vmem>>, vector<32x128xf32>
    %cst_11 = arith.constant dense<0.000000e+00> : vector<2x128xf32>
    %10 = tpu.matmul %5, %9, %cst_11 {dimension_numbers = #tpu.dot_dimension_numbers<[1], [0], [0], [1], [0, 0, 1, 1], [], []>} : vector<2x32xf32>, vector<32x128xf32>, vector<2x128xf32> -> vector<2x128xf32>
    %11 = arith.addf %8, %10 : vector<2x128xf32>
    %c0_12 = arith.constant 0 : index
    %c0_13 = arith.constant 0 : index
    %12 = vector.load %arg4[%c0_12, %c0_13] : memref<1x128xf32, #tpu.memory_space<vmem>>, vector<1x128xf32>
    %13 = vector.broadcast %12 : vector<1x128xf32> to vector<2x128xf32>
    %14 = arith.addf %11, %13 : vector<2x128xf32>
    %15 = vector.extract_strided_slice %14 {offsets = [0, 0], sizes = [2, 32], strides = [1, 1]} : vector<2x128xf32> to vector<2x32xf32>
    %16 = arith.negf %15 : vector<2x32xf32>
    %17 = math.exp %16 : vector<2x32xf32>
    %cst_14 = arith.constant 1.000000e+00 : f32
    %18 = vector.broadcast %cst_14 : f32 to vector<2x32xf32>
    %19 = arith.addf %18, %17 : vector<2x32xf32>
    %20 = arith.divf %18, %19 : vector<2x32xf32>
    %21 = vector.extract_strided_slice %14 {offsets = [0, 32], sizes = [2, 32], strides = [1, 1]} : vector<2x128xf32> to vector<2x32xf32>
    %22 = arith.negf %21 : vector<2x32xf32>
    %23 = math.exp %22 : vector<2x32xf32>
    %cst_15 = arith.constant 1.000000e+00 : f32
    %24 = vector.broadcast %cst_15 : f32 to vector<2x32xf32>
    %25 = arith.addf %24, %23 : vector<2x32xf32>
    %26 = arith.divf %24, %25 : vector<2x32xf32>
    %27 = vector.extract_strided_slice %14 {offsets = [0, 64], sizes = [2, 32], strides = [1, 1]} : vector<2x128xf32> to vector<2x32xf32>
    %28 = math.tanh %27 : vector<2x32xf32>
    %29 = vector.extract_strided_slice %14 {offsets = [0, 96], sizes = [2, 32], strides = [1, 1]} : vector<2x128xf32> to vector<2x32xf32>
    %30 = arith.negf %29 : vector<2x32xf32>
    %31 = math.exp %30 : vector<2x32xf32>
    %cst_16 = arith.constant 1.000000e+00 : f32
    %32 = vector.broadcast %cst_16 : f32 to vector<2x32xf32>
    %33 = arith.addf %32, %31 : vector<2x32xf32>
    %34 = arith.divf %32, %33 : vector<2x32xf32>
    %35 = arith.mulf %26, %6 : vector<2x32xf32>
    %36 = arith.mulf %20, %28 : vector<2x32xf32>
    %37 = arith.addf %35, %36 : vector<2x32xf32>
    %38 = math.tanh %37 : vector<2x32xf32>
    %39 = arith.mulf %34, %38 : vector<2x32xf32>
    %c0_17 = arith.constant 0 : index
    %c0_18 = arith.constant 0 : index
    %40 = vector.load %arg5[%c0_17, %c0_18] : memref<2x32xf32, #tpu.memory_space<vmem>>, vector<2x32xf32>
    tpu.vector_store %arg5[%c0_17, %c0_18], %39 {strides = array<i32>} : memref<2x32xf32, #tpu.memory_space<vmem>>, vector<2x32xf32>,
    %c0_19 = arith.constant 0 : index
    %c0_20 = arith.constant 0 : index
    %41 = vector.load %arg6[%c0_19, %c0_20] : memref<2x32xf32, #tpu.memory_space<vmem>>, vector<2x32xf32>
    tpu.vector_store %arg6[%c0_19, %c0_20], %37 {strides = array<i32>} : memref<2x32xf32, #tpu.memory_space<vmem>>, vector<2x32xf32>,
    return
  }
  func.func @transform_0(%arg0: i32) -> (i32, i32, i32) {
    %c0_i32 = arith.constant 0 : i32
    %c0_i32_0 = arith.constant 0 : i32
    %c0_i32_1 = arith.constant 0 : i32
    return %arg0, %c0_i32, %c0_i32_0 : i32, i32, i32
  }
  func.func @transform_1(%arg0: i32) -> (i32, i32) {
    %c0_i32 = arith.constant 0 : i32
    %c0_i32_0 = arith.constant 0 : i32
    %c0_i32_1 = arith.constant 0 : i32
    return %c0_i32, %c0_i32_0 : i32, i32
  }
  func.func @transform_2(%arg0: i32) -> (i32, i32) {
    %c0_i32 = arith.constant 0 : i32
    %c0_i32_0 = arith.constant 0 : i32
    %c0_i32_1 = arith.constant 0 : i32
    return %c0_i32, %c0_i32_0 : i32, i32
  }
  func.func @transform_3(%arg0: i32) -> (i32, i32) {
    %c0_i32 = arith.constant 0 : i32
    %c0_i32_0 = arith.constant 0 : i32
    %c0_i32_1 = arith.constant 0 : i32
    return %c0_i32, %c0_i32_0 : i32, i32
  }
  func.func @transform_4(%arg0: i32) -> (i32, i32) {
    %c0_i32 = arith.constant 0 : i32
    %c0_i32_0 = arith.constant 0 : i32
    %c0_i32_1 = arith.constant 0 : i32
    return %c0_i32, %c0_i32_0 : i32, i32
  }
  func.func @transform_5(%arg0: i32) -> (i32, i32) {
    %c0_i32 = arith.constant 0 : i32
    %c0_i32_0 = arith.constant 0 : i32
    %c0_i32_1 = arith.constant 0 : i32
    return %c0_i32, %c0_i32_0 : i32, i32
  }
}

</mosaic_0001>

<bundles_post_ra>
// kernel: tpu_custom_call.1
= control target key start
LH: loop header
LB: loop body
LE: loop exit
PB: predicated region body
PF: predicated region fallthrough
CT: control target
= control target key end

     0   :  { %11 = vsyncpa [#allocation3], 0  ;;  %s763_s0 = inlined_call_operand.vmem [shape: f32[16,2,4], index: 0, kind: input, shape index: {}]   ;;  %s764_s1 = inlined_call_operand.vmem [shape: f32[4,128], index: 1, kind: input, shape index: {}]   ;;  %s765_s2 = inlined_call_operand.vmem [shape: f32[32,128], index: 2, kind: input, shape index: {}]   ;;  %s766_s3 = inlined_call_operand.vmem [shape: f32[1,128], index: 3, kind: input, shape index: {}]   ;;  %s767_s4 = inlined_call_operand.hbm [shape: f32[2,32], index: 4, kind: output, shape index: {0}]   ;;  %s768_s5 = inlined_call_operand.hbm [shape: f32[2,32], index: 5, kind: output, shape index: {1}]  }
   0x1   :  { %12 = vsyncpa [#allocation5], 0  ;;  %s679_s18 = smov 0  }
   0x2 LB: > { %s685_s19 = sadd.s32 4294967295, %s638_s18   ;;  %p492_p0 = scmp.ge.s32.totalorder %s638_s18, 1  ;;  %s638_s18 = sphi %s679_s18, %s18_s18  }
   0x3   : > { %p181_p1 = scmp.lt.s32.totalorder %s638_s18, 17 }
   0x5   : > { %p182_p2 = pnand %p492_p0, %p181_p1 }
   0x6   : > { %p203_p3 = scmp.lt.s32.totalorder (!%p182_p2), %s685_s19, 15  ;;  %p494_p4 = scmp.ne.s32.totalorder (!%p182_p2), %s685_s19, 0 }
   0x7   : > { %185 = sbr.rel (%p182_p2) target bundleno = 753 (0x2f1), region = 36 }
   0xe   : > { %s204_s20 = scalar_select %p203_p3, %s685_s19, 15 }
   0xf   : > { %210 = sbr.rel (%p494_p4) target bundleno = 22 (0x16), region = 40  ;;  %vm211_vm0 = vcmask (!%p494_p4), 254976   ;;  %v640_v0 = vmov (!%p494_p4), 0.0  }
  0x10   : > { %s493_s21 = sshll.u32 %s204_s20, 1  ;;  %212 = vst.msk [vmem:[#allocation2] sm:$0x3] (!%p494_p4), %vm211_vm0, %v640_v0  ;;  %213 = vst.msk [vmem:[#allocation4] sm:$0x3] (!%p494_p4), %vm211_vm0, %v640_v0 }
  0x11   : > { %s206_s24 = scalar_lea.vmem %s763_s0, %s493_s21 }
  0x16 PF: > { %v218_v1 = vld [vmem:[%s765_s2] sm:$0xff]  ;;  %v219_v2 = vld [vmem:[%s765_s2 + $0x8] sm:$0xff]  ;;  %v220_v3 = vld [vmem:[%s765_s2 + $0x10] sm:$0xff]  ;;  %vm300_vm1 = vcmask 1043456   ;;  %v641_v4 = vmov 0.0|0.0   ;;  %v642_v7 = vmov 0.0  }
  0x17   : > { %529 = vmatprep.subr.bf16.mxu0 %v641_v4  ;;  %v530_v5 = vpack.c.bf16 %v219_v2, %v218_v1  ;;  %v221_v6 = vld [vmem:[%s765_s2 + $0x18] sm:$0xff]  ;;  %524 = vmatprep.subr.mxu1 %v642_v7  ;;  %v217_v8 = vld [vmem:[%s764_s1] sm:$0xf]  ;;  %vm643_vm2 = vmmov 0   ;;  %vm296_vm3 = vcmask 31744   ;;  %vm222_vm4 = vcmask 261120  }
  0x18   : > { %v214_v9 = vld [vmem:[%s206_s24] sm:$0x3]  ;;  %525 = vmatpush3.msk.msra.mxu1 %vm300_vm1, %v217_v8  ;;  %526 = vmatprep.mubr.msk.f32.mxu1 %vm643_vm2, %v642_v7  ;;  %v533_v10 = vpack.c.bf16 %v221_v6, %v220_v3  ;;  %s644_s12 = smov 64   ;;  %v216_v20 = vld [vmem:[#allocation4] sm:$0x3]  ;;  %s645_s13 = smov 32  }
  0x19   : > { %531 = vmatpush3.bf16.msra.mxu0 %v530_v5  ;;  %521 = vmatprep.mubr.msk.f32.mxu0 %vm643_vm2, %v642_v7  ;;  %v215_v11 = vld [vmem:[#allocation2] sm:$0x3]  ;;  %s646_s14 = smov 96   ;;  %s647_s15 = smov [#allocation4]   ;;  %vm414_vm5 = vcmask 254976  }
  0x1a   : > { %532 = vmatprep.subr.bf16.mxu0 %v641_v4  ;;  %527 = vmatmul.mubr.msk.f32.vlgmr.msra.gmra.mrb[0].mxu1 %vm296_vm3, %v214_v9  ;;  %v498_v15 = vld [vmem:[%s766_s3] ss:$0 sm:$0xff]  ;;  %s439_s16 = sshll.u32 %s647_s15, 4  ;;  %p543_p5 = scmp.eq.s32.totalorder %s685_s19, 15  ;;  %s440_s16 = int_to_ptr.vmem [resolvable:$true] %s439_s16 }
  0x1b   : > { %s572_s17 = scalar_lea.vmem %s440_s16, 32  ;;  %p579_p9 = scmp.lt.s32.totalorder %s440_s16, %s440_s16 }
  0x1c   : > { %p573_p6 = scmp.ne.s32.totalorder %s440_s16, %s572_s17  ;;  %p580_p10 = scmp.lt.s32.totalorder %s572_s17, %s572_s17 }
  0x1d   : > { %534 = vmatpush3.bf16.msra.mxu0 %v533_v10 }
  0x1e   : > { %p574_p7 = pnand %p573_p6, %p543_p5  ;;  %p581_p11 = por %p580_p10, %p579_p9 }
  0x20   : > { %522 = vmatmul.mubr.msk.f32.vlgmr.msra.gmra.mrb[0].mxu0 %vm222_vm4, %v215_v11  ;;  %p575_p8 = pneg %p574_p7 }
  0x22   : > { %p582_p12 = pnand %p581_p11, %p575_p8 }
  0xed   : > { %v370_v12 = vpop.f32.mrb[0].mxu1 }
  0xee   : > { %v528_v13 = vpop.f32.mrb[1].mxu1 }
  0xf3   : > { %v292_v14 = vpop.f32.mrb[0].mxu0 }
  0xf4   : > { %v371_v16 = vadd.f32 %v370_v12, %v292_v14  ;;  %v523_v17 = vpop.f32.mrb[1].mxu0 }
  0xf6   : > { %v381_v18 = vadd.f32 %v498_v15, %v371_v16 }
  0xf8   : > { %564 = vtanh.f32 %v381_v18  ;;  %v499_v21 = vmul.f32 -1.442695, %v381_v18 }
  0xfa   : > { %566 = vpow2.f32 %v499_v21 }
 0x102   : > { %v565_v19 = vpop.eup %564 }
 0x103   : > { %395 = vrot.lane.b32.xlu0 %v565_v19, %s644_s12 }
 0x104   : > { %v567_v22 = vpop.eup %566 }
 0x105   : > { %v385_v23 = vadd.f32 1.0, %v567_v22 }
 0x107   : > { %390 = vrot.lane.b32.xlu0 %v216_v20, %s645_s13  ;;  %568 = vrcp.f32 %v385_v23 }
 0x111   : > { %v569_v24 = vpop.eup %568 }
 0x175   : > { %v396_v25 = vpop.permute.xlu0 %395 }
 0x176   : > { %v398_v26 = vmul.f32 %v569_v24, %v396_v25 }
 0x178   : > { %400 = vrot.lane.b32.xlu1 %v398_v26, %s645_s13 }
 0x179   : > { %v391_v27 = vpop.permute.xlu0 %390 }
 0x17a   : > { %v393_v28 = vmul.f32 %v569_v24, %v391_v27 }
 0x1ea   : > { %v401_v29 = vpop.permute.xlu1 %400 }
 0x1eb   : > { %v403_v30 = vadd.f32 %v401_v29, %v393_v28 }
 0x1ed   : > { %570 = vtanh.f32 %v403_v30 }
 0x1f7   : > { %v571_v31 = vpop.eup %570 }
 0x1f8   : > { %406 = vrot.lane.b32.xlu1 %v571_v31, %s644_s12 }
 0x1fc   : > { %417 = vrot.lane.b32.xlu1 %v403_v30, %s646_s14 }
 0x26a   : > { %v407_v32 = vpop.permute.xlu1 %406 }
 0x26b   : > { %v409_v33 = vmul.f32 %v569_v24, %v407_v32 }
 0x26d   : > { %411 = vrot.lane.b32.xlu0 %v409_v33, %s645_s13 }
 0x26e   : > { %v418_v34 = vpop.permute.xlu1 %417 }
 0x26f   : > { %420 = vst.msk [vmem:[#allocation4] sm:$0x3] %vm414_vm5, %v418_v34 }
 0x270   : > { %585 = shalt.err (!%p582_p12)
}
 0x271   : > { %s586_s22 = scalar_lea.hbm %s768_s5, 32 }
 0x272   : > { %p587_p13 = scmp.ne.s32.totalorder %s768_s5, %s586_s22  ;;  %p592_p2 = scmp.lt.u32.totalorder %s586_s22, %s768_s5 }
 0x274   : > { %p588_p0 = pnand %p587_p13, %p543_p5 }
 0x276   : > { %p589_p1 = pneg %p588_p0 }
 0x278   : > { %p594_p3 = pnand %p592_p2, %p589_p1 }
 0x27a   : > { %597 = shalt.err (!%p594_p3)
}
 0x27b   : > { %538 = dma.vmem_to_hbm [thread:$0]  (%p543_p5), %s440_s16, 32, %s768_s5, [#allocation5]  }
 0x27c   : > { %s648_s29 = smov [#allocation2]  }
 0x27d   : > { %s428_s30 = sshll.u32 %s648_s29, 4  ;;  %s429_s30 = int_to_ptr.vmem [resolvable:$true] %s428_s30 }
 0x27e   : > { %s598_s6 = scalar_lea.vmem %s429_s30, 32  ;;  %p605_p8 = scmp.lt.s32.totalorder %s429_s30, %s429_s30 }
 0x27f   : > { %p599_p4 = scmp.ne.s32.totalorder %s429_s30, %s598_s6  ;;  %p606_p9 = scmp.lt.s32.totalorder %s598_s6, %s598_s6 }
 0x281   : > { %p600_p6 = pnand %p599_p4, %p543_p5  ;;  %p607_p10 = por %p606_p9, %p605_p8 }
 0x283   : > { %p601_p7 = pneg %p600_p6 }
 0x285   : > { %p608_p11 = pnand %p607_p10, %p601_p7 }
 0x2df   : > { %v412_v35 = vpop.permute.xlu0 %411 }
 0x2e0   : > { %415 = vst.msk [vmem:[#allocation2] sm:$0x3] %vm414_vm5, %v412_v35 }
 0x2e1   : > { %611 = shalt.err (!%p608_p11)
}
 0x2e2   : > { %s612_s9 = scalar_lea.hbm %s767_s4, 32 }
 0x2e3   : > { %p613_p12 = scmp.ne.s32.totalorder %s767_s4, %s612_s9  ;;  %p618_p1 = scmp.lt.u32.totalorder %s612_s9, %s767_s4 }
 0x2e5   : > { %p614_p13 = pnand %p613_p12, %p543_p5 }
 0x2e7   : > { %p615_p0 = pneg %p614_p13 }
 0x2e9   : > { %p620_p2 = pnand %p618_p1, %p615_p0 }
 0x2eb   : > { %623 = shalt.err (!%p620_p2)
}
 0x2ec   : > { %536 = dma.vmem_to_hbm [thread:$0]  (%p543_p5), %s429_s30, 32, %s767_s4, [#allocation3]  }
 0x2ed   : > { %629 = dma.done.wait (%p543_p5), [#allocation3], 32  }
 0x2ee   : > { %631 = vsyncadd (%p543_p5), [#allocation3], 4294967264 }
 0x2ef   : > { %633 = dma.done.wait (%p543_p5), [#allocation5], 32  }
 0x2f0   : > { %635 = vsyncadd (%p543_p5), [#allocation5], 4294967264 }
 0x2f1 PF: > { %s18_s18 = sadd.s32 1, %s638_s18  }
 0x2f2   : > { %p15_p3 = scmp.ge.s32.totalorder %s18_s18, 18  }
 0x2f4   :  { %17 = sbr.rel (!%p15_p3) target bundleno = 2 (0x2), region = 75 }
 0x2fb   :  { %456 = vsyncpa [#allocation3], 1 }
 0x2fc   :  { %458 = vsyncpa [#allocation3 + $0x1], 1 }
 0x2fd   :  { %459 = vsyncpa [#allocation5], 1 }

</bundles_post_ra>
